<compile_context>
chip_gen: v7x
topology: tpu7x:2x2x1
jax: 0.10.0
libtpu: 0.0.40
codegen_flags: <defaults>
</compile_context>

<pallas_src>
import functools

import jax
import jax.numpy as jnp
from jax.experimental import pallas as pl
from jax.experimental.pallas import tpu as pltpu


def _round_up(x: int, m: int) -> int:
    return ((x + m - 1) // m) * m


def mlp_agent_kernel(x_ref, w1_ref, w2_ref, w3_ref, b3_ref, o_ref, *,
                     out_size, approx_recip):
    # In-kernel f32 -> bf16 cast (VPU op, hidden under the DMA of this
    # memory-bound kernel); all accumulation stays f32 on the MXU.
    x_bf = x_ref[...].astype(jnp.bfloat16)

    # Layer 1: Linear(input_size, 128, bias=False) + ReLU
    h1 = jnp.dot(x_bf, w1_ref[...], preferred_element_type=jnp.float32)
    h1 = jnp.maximum(h1, 0.0)

    # Layer 2: Linear(128, 128, bias=False) + ReLU
    h2 = jnp.dot(h1.astype(jnp.bfloat16), w2_ref[...],
                 preferred_element_type=jnp.float32)
    h2 = jnp.maximum(h2, 0.0)

    # Dropout(p=0.5): eval-mode identity.
    # TODO(synk): training-mode dropout would need pltpu.prng_seed /
    # pltpu.prng_random_bits masking to match PyTorch's stochastic behavior.

    # Output layer: Linear(128, n_pad) with bias. Padded w3 columns are zero
    # and padded bias entries are -1e30, so pad lanes contribute exp(-inf)~0
    # to the softmax with no extra masking ops.
    logits = jnp.dot(h2.astype(jnp.bfloat16), w3_ref[...],
                     preferred_element_type=jnp.float32)
    logits = logits + b3_ref[...]          # b3 is [1, n_pad], broadcasts

    # Numerically-stable softmax over the feature dim (all f32).
    m = jnp.max(logits, axis=-1, keepdims=True)
    e = jnp.exp(logits - m)
    denom = jnp.sum(e, axis=-1, keepdims=True)
    probs = e * pl.reciprocal(denom, approx=approx_recip)

    # Only the real out_size lanes go back to HBM (8x fewer writeback bytes
    # than a 128-lane padded f32 store; accepted vst.msk in VMEM).
    o_ref[...] = probs[:, :out_size].astype(o_ref.dtype)


def prepare_mlp_agent_params(w1, w2, w3, b3):
    """Pad / cast weights once (call at agent init, NOT once per forward)."""
    out_size = w3.shape[1]
    n_pad = _round_up(max(out_size, 128), 128)

    w1b = w1.astype(jnp.bfloat16)
    w2b = w2.astype(jnp.bfloat16)
    w3b = jnp.zeros((w3.shape[0], n_pad), jnp.bfloat16).at[:, :out_size].set(
        w3.astype(jnp.bfloat16))
    # Fold pad-lane masking into the bias: padded w3 columns are zero, so the
    # padded logits equal the padded bias == -1e30.
    b3f = jnp.full((1, n_pad), -1e30, jnp.float32).at[:, :out_size].set(
        b3.reshape(1, -1).astype(jnp.float32))
    return dict(w1=w1b, w2=w2b, w3=w3b, b3=b3f, out_size=out_size)


# Batch tiling constants.
_SMALL_BATCH = 512   # <= this: single gridless, fully VMEM-resident call
_MAX_TILE = 1024     # multiple of 256 -> full-height MXU passes on v6e/v7x


def mlp_agent_forward(x, params, input_size, *, approx_recip=False):
    x2d = x.reshape(-1, input_size)              # torch's x.view(-1, input_size)
    batch = x2d.shape[0]
    out_size = params["out_size"]

    w1b, w2b, w3b, b3f = params["w1"], params["w2"], params["w3"], params["b3"]
    kernel = functools.partial(mlp_agent_kernel, out_size=out_size,
                               approx_recip=approx_recip)
    out_shape = jax.ShapeDtypeStruct((batch, out_size), jnp.float32)

    if batch <= _SMALL_BATCH:
        # Gridless: whole (tiny) problem in one VMEM-resident block — no
        # pipeline bookkeeping or per-operand double-buffering.
        vmem = pl.BlockSpec(memory_space=pltpu.MemorySpace.VMEM)
        return pl.pallas_call(
            kernel, out_shape=out_shape,
            in_specs=[vmem, vmem, vmem, vmem, vmem],
            out_specs=vmem,
        )(x2d, w1b, w2b, w3b, b3f)

    # Gridded path: big batch tiles amortize the ~0.35us per-step overhead;
    # guarantee >= 2 grid steps so v7x's two TensorCores both get work on the
    # "parallel" axis.  The cdiv grid handles a ragged last tile: garbage rows
    # read into VMEM are never written back to the (batch, out_size) output.
    bm = min(_MAX_TILE, max(256, _round_up(pl.cdiv(batch, 2), 256)))
    grid = (pl.cdiv(batch, bm),)

    return pl.pallas_call(
        kernel, out_shape=out_shape,
        grid=grid,
        in_specs=[
            pl.BlockSpec((bm, input_size), lambda i: (i, 0)),
            pl.BlockSpec(w1b.shape, lambda i: (0, 0)),
            pl.BlockSpec(w2b.shape, lambda i: (0, 0)),
            pl.BlockSpec(w3b.shape, lambda i: (0, 0)),
            pl.BlockSpec(b3f.shape, lambda i: (0, 0)),
        ],
        out_specs=pl.BlockSpec((bm, out_size), lambda i: (i, 0)),
        compiler_params=pltpu.CompilerParams(
            dimension_semantics=("parallel",)),
    )(x2d, w1b, w2b, w3b, b3f)


def _reference(x, w1, w2, w3, b3):
    # Pure-JAX reference with the same bf16-in / f32-accumulate numerics.
    h1 = jnp.maximum(jnp.dot(x.astype(jnp.bfloat16), w1.astype(jnp.bfloat16),
                             preferred_element_type=jnp.float32), 0.0)
    h2 = jnp.maximum(jnp.dot(h1.astype(jnp.bfloat16), w2.astype(jnp.bfloat16),
                             preferred_element_type=jnp.float32), 0.0)
    logits = jnp.dot(h2.astype(jnp.bfloat16), w3.astype(jnp.bfloat16),
                     preferred_element_type=jnp.float32) + b3.reshape(1, -1)
    return jax.nn.softmax(logits, axis=-1)


if __name__ == "__main__":
    # Small shapes consistent with the module:
    #   input_size=64, hidden layers [128, 128], output_size=16, batch=8
    input_size = 64
    hidden = 128
    output_size = 16
    batch = 8

    key = jax.random.PRNGKey(0)
    kx, k1, k2, k3, kb = jax.random.split(key, 5)

    x = jax.random.normal(kx, (batch, input_size), dtype=jnp.float32)
    w1 = jax.random.normal(k1, (input_size, hidden), dtype=jnp.float32) * 0.1
    w2 = jax.random.normal(k2, (hidden, hidden), dtype=jnp.float32) * 0.1
    w3 = jax.random.normal(k3, (hidden, output_size), dtype=jnp.float32) * 0.1
    b3 = jax.random.normal(kb, (1, output_size), dtype=jnp.float32) * 0.1

    # Hoisted weight prep (done once, like agent __init__).
    params = prepare_mlp_agent_params(w1, w2, w3, b3)

    # --- small-batch (gridless) path ---------------------------------------
    out = mlp_agent_forward(x, params, input_size)
    out = jax.block_until_ready(out)

    ref = _reference(x, w1, w2, w3, b3)
    assert out.shape == (batch, output_size)
    assert jnp.allclose(jnp.sum(out, axis=-1), 1.0, atol=1e-3)
    assert jnp.allclose(out, ref, atol=5e-3, rtol=5e-2)

    # --- larger, ragged batch exercises the gridded "parallel" path ---------
    big_batch = 2500   # not a multiple of the tile -> ragged last block
    xb = jax.random.normal(kx, (big_batch, input_size), dtype=jnp.float32)
    out_big = mlp_agent_forward(xb, params, input_size)
    out_big = jax.block_until_ready(out_big)
    ref_big = _reference(xb, w1, w2, w3, b3)
    assert out_big.shape == (big_batch, output_size)
    assert jnp.allclose(jnp.sum(out_big, axis=-1), 1.0, atol=1e-3)
    assert jnp.allclose(out_big, ref_big, atol=5e-3, rtol=5e-2)

    print("KERNEL_OK")
</pallas_src>

<mosaic_0001>
module attributes {stable_mosaic.version = 11 : i64} {
  func.func @mlp_agent_kernel(%arg0: memref<8x64xf32, #tpu.memory_space<vmem>>, %arg1: memref<64x128xbf16, #tpu.memory_space<vmem>>, %arg2: memref<128x128xbf16, #tpu.memory_space<vmem>>, %arg3: memref<128x128xbf16, #tpu.memory_space<vmem>>, %arg4: memref<1x128xf32, #tpu.memory_space<vmem>>, %arg5: memref<8x16xf32, #tpu.memory_space<vmem>>) attributes {dimension_semantics = [], scalar_prefetch = 0 : i64, scratch_operands = 0 : i64, tpu.core_type = #tpu.core_type<tc>} {
    %c0 = arith.constant 0 : index
    %c0_0 = arith.constant 0 : index
    %0 = vector.load %arg0[%c0, %c0_0] : memref<8x64xf32, #tpu.memory_space<vmem>>, vector<8x64xf32>
    %1 = arith.truncf %0 : vector<8x64xf32> to vector<8x64xbf16>
    %c0_1 = arith.constant 0 : index
    %c0_2 = arith.constant 0 : index
    %2 = vector.load %arg1[%c0_1, %c0_2] : memref<64x128xbf16, #tpu.memory_space<vmem>>, vector<64x128xbf16>
    %cst = arith.constant dense<0.000000e+00> : vector<8x128xf32>
    %3 = tpu.matmul %1, %2, %cst {dimension_numbers = #tpu.dot_dimension_numbers<[1], [0], [0], [1], [0, 0, 1, 1], [], []>} : vector<8x64xbf16>, vector<64x128xbf16>, vector<8x128xf32> -> vector<8x128xf32>
    %cst_3 = arith.constant 0.000000e+00 : f32
    %4 = vector.broadcast %cst_3 : f32 to vector<8x128xf32>
    %5 = arith.maximumf %3, %4 : vector<8x128xf32>
    %6 = arith.truncf %5 : vector<8x128xf32> to vector<8x128xbf16>
    %c0_4 = arith.constant 0 : index
    %c0_5 = arith.constant 0 : index
    %7 = vector.load %arg2[%c0_4, %c0_5] : memref<128x128xbf16, #tpu.memory_space<vmem>>, vector<128x128xbf16>
    %cst_6 = arith.constant dense<0.000000e+00> : vector<8x128xf32>
    %8 = tpu.matmul %6, %7, %cst_6 {dimension_numbers = #tpu.dot_dimension_numbers<[1], [0], [0], [1], [0, 0, 1, 1], [], []>} : vector<8x128xbf16>, vector<128x128xbf16>, vector<8x128xf32> -> vector<8x128xf32>
    %cst_7 = arith.constant 0.000000e+00 : f32
    %9 = vector.broadcast %cst_7 : f32 to vector<8x128xf32>
    %10 = arith.maximumf %8, %9 : vector<8x128xf32>
    %11 = arith.truncf %10 : vector<8x128xf32> to vector<8x128xbf16>
    %c0_8 = arith.constant 0 : index
    %c0_9 = arith.constant 0 : index
    %12 = vector.load %arg3[%c0_8, %c0_9] : memref<128x128xbf16, #tpu.memory_space<vmem>>, vector<128x128xbf16>
    %cst_10 = arith.constant dense<0.000000e+00> : vector<8x128xf32>
    %13 = tpu.matmul %11, %12, %cst_10 {dimension_numbers = #tpu.dot_dimension_numbers<[1], [0], [0], [1], [0, 0, 1, 1], [], []>} : vector<8x128xbf16>, vector<128x128xbf16>, vector<8x128xf32> -> vector<8x128xf32>
    %c0_11 = arith.constant 0 : index
    %c0_12 = arith.constant 0 : index
    %14 = vector.load %arg4[%c0_11, %c0_12] : memref<1x128xf32, #tpu.memory_space<vmem>>, vector<1x128xf32>
    %15 = vector.broadcast %14 : vector<1x128xf32> to vector<8x128xf32>
    %16 = arith.addf %13, %15 : vector<8x128xf32>
    %cst_13 = arith.constant dense<0xFF800000> : vector<8xf32>
    %17 = vector.multi_reduction <maximumf>, %16, %cst_13 [1] : vector<8x128xf32> to vector<8xf32>
    %18 = vector.shape_cast %17 : vector<8xf32> to vector<8x1xf32>
    %19 = vector.broadcast %18 : vector<8x1xf32> to vector<8x128xf32>
    %20 = arith.subf %16, %19 : vector<8x128xf32>
    %21 = math.exp %20 : vector<8x128xf32>
    %cst_14 = arith.constant dense<0.000000e+00> : vector<8xf32>
    %22 = vector.multi_reduction <add>, %21, %cst_14 [1] : vector<8x128xf32> to vector<8xf32>
    %23 = vector.shape_cast %22 : vector<8xf32> to vector<8x1xf32>
    %24 = tpu.reciprocal %23 : vector<8x1xf32> -> vector<8x1xf32>
    %25 = vector.broadcast %24 : vector<8x1xf32> to vector<8x128xf32>
    %26 = arith.mulf %21, %25 : vector<8x128xf32>
    %27 = vector.extract_strided_slice %26 {offsets = [0, 0], sizes = [8, 16], strides = [1, 1]} : vector<8x128xf32> to vector<8x16xf32>
    %c0_15 = arith.constant 0 : index
    %c0_16 = arith.constant 0 : index
    %28 = vector.load %arg5[%c0_15, %c0_16] : memref<8x16xf32, #tpu.memory_space<vmem>>, vector<8x16xf32>
    tpu.vector_store %arg5[%c0_15, %c0_16], %27 {strides = array<i32>} : memref<8x16xf32, #tpu.memory_space<vmem>>, vector<8x16xf32>,
    return
  }
}

</mosaic_0001>

<bundles_post_ra>
// kernel: tpu_custom_call.1
= control target key start
LH: loop header
LB: loop body
LE: loop exit
PB: predicated region body
PF: predicated region fallthrough
CT: control target
= control target key end

     0   :  { %10 = vsyncpa [#allocation3], 0  ;;  %s785_s0 = inlined_call_operand.hbm [shape: f32[8,64], index: 0, kind: input, shape index: {}]   ;;  %s786_s1 = inlined_call_operand.hbm [shape: bf16[64,128], index: 1, kind: input, shape index: {}]   ;;  %s787_s2 = inlined_call_operand.hbm [shape: bf16[128,128], index: 2, kind: input, shape index: {}]   ;;  %s788_s3 = inlined_call_operand.hbm [shape: bf16[128,128], index: 3, kind: input, shape index: {}]   ;;  %s789_s4 = inlined_call_operand.vmem [shape: f32[1,128], index: 4, kind: input, shape index: {}]   ;;  %s790_s5 = inlined_call_operand.hbm [shape: f32[8,16], index: 5, kind: output, shape index: {}]  }
   0x1   :  { %11 = vsyncpa [#allocation6], 0 }
   0x2   :  { %12 = vsyncpa [#allocation9], 0 }
   0x3   :  { %13 = vsyncpa [#allocation4], 0  ;;  %s648_s18 = smov [#allocation5]   ;;  %s530_s22 = scalar_lea.hbm %s786_s1, 512 }
   0x4   :  { %s29_s19 = sshll.u32 %s648_s18, 4  ;;  %p531_p0 = scmp.ne.s32.totalorder %s786_s1, %s530_s22  ;;  %s30_s19 = int_to_ptr.vmem [resolvable:$true] %s29_s19 }
   0x5   :  { %p534_p1 = scmp.lt.u32.totalorder %s530_s22, %s786_s1 }
   0x7   :  { %p536_p2 = pnand %p534_p1, %p531_p0 }
   0x9   :  { %539 = shalt.err (!%p536_p2)
}
   0xa   :  { %s540_s27 = scalar_lea.vmem %s30_s19, 512  ;;  %p545_p4 = scmp.lt.s32.totalorder %s30_s19, %s30_s19 }
   0xb   :  { %p541_p3 = scmp.ne.s32.totalorder %s30_s19, %s540_s27  ;;  %p546_p5 = scmp.lt.s32.totalorder %s540_s27, %s540_s27 }
   0xd   :  { %p547_p6 = por %p546_p5, %p545_p4 }
   0xf   :  { %p548_p7 = pnand %p547_p6, %p541_p3 }
  0x11   :  { %551 = shalt.err (!%p548_p7)
}
  0x12   :  { %s649_s28 = smov 64   ;;  %s650_s29 = smov 4  }
  0x13   :  { %35 = dma.hbm_to_vmem [thread:$0]  %s786_s1, 512, %s30_s19, [#allocation6], %s649_s28, %s649_s28, %s650_s29  }
  0x14   :  { %s651_s7 = smov [#allocation2]   ;;  %s652_s9 = smov [#allocation7]  }
  0x15   :  { %s20_s8 = sshll.u32 %s651_s7, 4  ;;  %s41_s10 = sshll.u32 %s652_s9, 4  ;;  %s21_s8 = int_to_ptr.vmem [resolvable:$true] %s20_s8  ;;  %s42_s10 = int_to_ptr.vmem [resolvable:$true] %s41_s10 }
  0x16   :  { %s552_s13 = scalar_lea.hbm %s785_s0, 128 }
  0x17   :  { %p553_p8 = scmp.ne.s32.totalorder %s785_s0, %s552_s13  ;;  %p556_p9 = scmp.lt.u32.totalorder %s552_s13, %s785_s0 }
  0x19   :  { %p558_p10 = pnand %p556_p9, %p553_p8 }
  0x1b   :  { %561 = shalt.err (!%p558_p10)
}
  0x1c   :  { %s562_s1 = scalar_lea.vmem %s21_s8, 128  ;;  %p567_p12 = scmp.lt.s32.totalorder %s21_s8, %s21_s8 }
  0x1d   :  { %p563_p11 = scmp.ne.s32.totalorder %s21_s8, %s562_s1  ;;  %p568_p13 = scmp.lt.s32.totalorder %s562_s1, %s562_s1 }
  0x1f   :  { %p569_p0 = por %p568_p13, %p567_p12 }
  0x21   :  { %p570_p1 = pnand %p569_p0, %p563_p11 }
  0x23   :  { %573 = shalt.err (!%p570_p1)
}
  0x24   :  { %23 = dma.hbm_to_vmem [thread:$0]  %s785_s0, 128, %s21_s8, [#allocation3]  }
  0x25   :  { %s574_s22 = scalar_lea.hbm %s787_s2, 1024 }
  0x26   :  { %p575_p2 = scmp.ne.s32.totalorder %s787_s2, %s574_s22  ;;  %p578_p3 = scmp.lt.u32.totalorder %s574_s22, %s787_s2 }
  0x28   :  { %p580_p4 = pnand %p578_p3, %p575_p2 }
  0x2a   :  { %583 = shalt.err (!%p580_p4)
}
  0x2b   :  { %s584_s27 = scalar_lea.vmem %s42_s10, 1024  ;;  %p589_p6 = scmp.lt.s32.totalorder %s42_s10, %s42_s10 }
  0x2c   :  { %p585_p5 = scmp.ne.s32.totalorder %s42_s10, %s584_s27  ;;  %p590_p7 = scmp.lt.s32.totalorder %s584_s27, %s584_s27 }
  0x2e   :  { %p591_p8 = por %p590_p7, %p589_p6 }
  0x30   :  { %p592_p9 = pnand %p591_p8, %p585_p5 }
  0x32   :  { %595 = shalt.err (!%p592_p9)
}
  0x33   :  { %47 = dma.hbm_to_vmem [thread:$0]  %s787_s2, 1024, %s42_s10, [#allocation6], %s649_s28, %s649_s28, %s650_s29  }
  0x34   :  { %s653_s6 = smov [#allocation8]   ;;  %s596_s11 = scalar_lea.hbm %s788_s3, 1024 }
  0x35   :  { %s53_s7 = sshll.u32 %s653_s6, 4  ;;  %p597_p10 = scmp.ne.s32.totalorder %s788_s3, %s596_s11  ;;  %s54_s7 = int_to_ptr.vmem [resolvable:$true] %s53_s7 }
  0x36   :  { %p600_p11 = scmp.lt.u32.totalorder %s596_s11, %s788_s3 }
  0x38   :  { %p602_p12 = pnand %p600_p11, %p597_p10 }
  0x3a   :  { %605 = shalt.err (!%p602_p12)
}
  0x3b   :  { %s606_s16 = scalar_lea.vmem %s54_s7, 1024  ;;  %p611_p0 = scmp.lt.s32.totalorder %s54_s7, %s54_s7 }
  0x3c   :  { %p607_p13 = scmp.ne.s32.totalorder %s54_s7, %s606_s16  ;;  %p612_p1 = scmp.lt.s32.totalorder %s606_s16, %s606_s16 }
  0x3e   :  { %p613_p2 = por %p612_p1, %p611_p0 }
  0x40   :  { %p614_p3 = pnand %p613_p2, %p607_p13 }
  0x42   :  { %617 = shalt.err (!%p614_p3)
}
  0x43   :  { %59 = dma.hbm_to_vmem [thread:$0]  %s788_s3, 1024, %s54_s7, [#allocation9], %s649_s28, %s649_s28, %s650_s29  }
  0x44   :  { %640 = dma.done.wait [#allocation3], 128  }
  0x45   :  { %641 = vsyncadd [#allocation3], 4294967168 }
  0x46   :  { %642 = dma.done.wait [#allocation6], 1536  }
  0x47   :  { %643 = vsyncadd [#allocation6], 4294965760 }
  0x48   :  { %644 = dma.done.wait [#allocation9], 1024  }
  0x49   :  { %645 = vsyncadd [#allocation9], 4294966272  ;;  %v654_v0 = vmov 0.0   ;;  %vm655_vm0 = vmmov 0   ;;  %v506_v1 = vld [vmem:[#allocation5] sm:$0xff]   ;;  %v507_v2 = vld [vmem:[#allocation5 + $0x8] sm:$0xff]  }
  0x4a   :  { %445 = vmatprep.subr.bf16.mxu0 %v654_v0  ;;  %453 = vmatprep.mubr.msk.bf16.mxu0 %vm655_vm0, %v654_v0  ;;  %v510_v3 = vld [vmem:[#allocation7] sm:$0xff]   ;;  %v508_v4 = vld [vmem:[#allocation5 + $0x10] sm:$0xff]   ;;  %v511_v5 = vld [vmem:[#allocation7 + $0x8] sm:$0xff]   ;;  %vm109_vm1 = vcmask 523264   ;;  %s656_s29 = smov [#allocation10]   ;;  %vm381_vm2 = vcmask 130048  }
  0x4b   :  { %457 = vmatprep.subr.bf16.mxu1 %v654_v0  ;;  %473 = vmatprep.mubr.msk.bf16.mxu1 %vm655_vm0, %v654_v0  ;;  %v509_v6 = vld [vmem:[#allocation5 + $0x18] sm:$0xff]   ;;  %v512_v8 = vld [vmem:[#allocation7 + $0x10] sm:$0xff]   ;;  %v514_v11 = vld [vmem:[#allocation7 + $0x20] sm:$0xff]   ;;  %s389_s17 = sshll.u32 %s656_s29, 4  ;;  %s390_s17 = int_to_ptr.vmem [resolvable:$true] %s389_s17 }
  0x4c   :  { %446 = vmatpush3.bf16.msra.mxu0 %v506_v1  ;;  %458 = vmatpush3.bf16.msra.mxu1 %v510_v3  ;;  %v75_v7 = vld [vmem:[#allocation2] sm:$0xff]  ;;  %v515_v12 = vld [vmem:[#allocation7 + $0x28] sm:$0xff]   ;;  %v516_v13 = vld [vmem:[#allocation7 + $0x30] sm:$0xff]   ;;  %p623_p5 = scmp.lt.s32.totalorder %s390_s17, %s390_s17 }
  0x4d   :  { %447 = vmatprep.subr.bf16.mxu0 %v654_v0  ;;  %459 = vmatprep.subr.bf16.mxu1 %v654_v0  ;;  %v76_v9 = vpack.c.bf16 %v75_v7, %v75_v7  ;;  %v513_v10 = vld [vmem:[#allocation7 + $0x18] sm:$0xff]   ;;  %v518_v15 = vld [vmem:[#allocation8] sm:$0xff]   ;;  %v519_v16 = vld [vmem:[#allocation8 + $0x8] sm:$0xff]  }
  0x4e   :  { %v517_v14 = vld [vmem:[#allocation7 + $0x38] sm:$0xff]   ;;  %v520_v17 = vld [vmem:[#allocation8 + $0x10] sm:$0xff]   ;;  %v522_v19 = vld [vmem:[#allocation8 + $0x20] sm:$0xff]  }
  0x4f   :  { %v521_v18 = vld [vmem:[#allocation8 + $0x18] sm:$0xff]   ;;  %v523_v20 = vld [vmem:[#allocation8 + $0x28] sm:$0xff]   ;;  %v524_v21 = vld [vmem:[#allocation8 + $0x30] sm:$0xff]  }
  0x50   :  { %448 = vmatpush3.bf16.msra.mxu0 %v507_v2  ;;  %460 = vmatpush3.bf16.msra.mxu1 %v511_v5  ;;  %v525_v28 = vld [vmem:[#allocation8 + $0x38] sm:$0xff]  }
  0x51   :  { %449 = vmatprep.subr.bf16.mxu0 %v654_v0  ;;  %461 = vmatprep.subr.bf16.mxu1 %v654_v0  ;;  %v413_v35 = vld [vmem:[%s789_s4] ss:$0 sm:$0xff]  ;;  %s618_s4 = scalar_lea.vmem %s390_s17, 128 }
  0x52   :  { %p619_p4 = scmp.ne.s32.totalorder %s390_s17, %s618_s4  ;;  %p624_p6 = scmp.lt.s32.totalorder %s618_s4, %s618_s4 }
  0x54   :  { %450 = vmatpush3.bf16.msra.mxu0 %v508_v4  ;;  %462 = vmatpush3.bf16.msra.mxu1 %v512_v8  ;;  %p625_p7 = por %p624_p6, %p623_p5 }
  0x55   :  { %451 = vmatprep.subr.bf16.mxu0 %v654_v0  ;;  %463 = vmatprep.subr.bf16.mxu1 %v654_v0 }
  0x56   :  { %p626_p8 = pnand %p625_p7, %p619_p4 }
  0x58   :  { %452 = vmatpush3.bf16.msra.mxu0 %v509_v6  ;;  %464 = vmatpush3.bf16.msra.mxu1 %v513_v10 }
  0x59   :  { %477 = vmatprep.subr.bf16.mxu0 %v654_v0  ;;  %465 = vmatprep.subr.bf16.mxu1 %v654_v0 }
  0x5b   :  { %454 = vmatmul.mubr.msk.bf16.vlgmr.msra.gmra.mrb[0].mxu0 %vm109_vm1, %v76_v9 }
  0x5c   :  { %493 = vmatprep.mubr.msk.bf16.mxu0 %vm655_vm0, %v654_v0  ;;  %466 = vmatpush3.bf16.msra.mxu1 %v514_v11 }
  0x5d   :  { %467 = vmatprep.subr.bf16.mxu1 %v654_v0  ;;  %478 = vmatpush3.bf16.msra.mxu0 %v518_v15 }
  0x5e   :  { %479 = vmatprep.subr.bf16.mxu0 %v654_v0 }
  0x60   :  { %468 = vmatpush3.bf16.msra.mxu1 %v515_v12 }
  0x61   :  { %469 = vmatprep.subr.bf16.mxu1 %v654_v0  ;;  %480 = vmatpush3.bf16.msra.mxu0 %v519_v16 }
  0x62   :  { %481 = vmatprep.subr.bf16.mxu0 %v654_v0 }
  0x64   :  { %470 = vmatpush3.bf16.msra.mxu1 %v516_v13 }
  0x65   :  { %471 = vmatprep.subr.bf16.mxu1 %v654_v0  ;;  %482 = vmatpush3.bf16.msra.mxu0 %v520_v17 }
  0x66   :  { %483 = vmatprep.subr.bf16.mxu0 %v654_v0 }
  0x68   :  { %472 = vmatpush3.bf16.msra.mxu1 %v517_v14 }
  0x69   :  { %484 = vmatpush3.bf16.msra.mxu0 %v521_v18 }
  0x6a   :  { %485 = vmatprep.subr.bf16.mxu0 %v654_v0 }
  0x6d   :  { %486 = vmatpush3.bf16.msra.mxu0 %v522_v19 }
  0x6e   :  { %487 = vmatprep.subr.bf16.mxu0 %v654_v0 }
  0x71   :  { %488 = vmatpush3.bf16.msra.mxu0 %v523_v20 }
  0x72   :  { %489 = vmatprep.subr.bf16.mxu0 %v654_v0 }
  0x75   :  { %490 = vmatpush3.bf16.msra.mxu0 %v524_v21 }
  0x76   :  { %491 = vmatprep.subr.bf16.mxu0 %v654_v0 }
  0x79   :  { %492 = vmatpush3.bf16.msra.mxu0 %v525_v28 }
 0x12e   :  { %v147_v22 = vpop.f32.mrb[0].mxu0 }
 0x12f   :  { %v153_v23 = vmax.f32 %v147_v22, 0.0  ;;  %v455_v24 = vpop.f32.mrb[1].mxu0 }
 0x130   :  { %v150_v25 = vpop.f32.mrb[2].mxu0 }
 0x131   :  { %v154_v26 = vpack.c.bf16 %v153_v23, %v153_v23  ;;  %v456_v27 = vpop.f32.mrb[3].mxu0 }
 0x133   :  { %474 = vmatmul.mubr.bf16.vlgmr.msra.gmra.mrb[0].mxu1 %v154_v26 }
 0x206   :  { %v253_v29 = vpop.f32.mrb[0].mxu1 }
 0x207   :  { %v259_v30 = vmax.f32 %v253_v29, 0.0  ;;  %v475_v31 = vpop.f32.mrb[1].mxu1 }
 0x208   :  { %v256_v32 = vpop.f32.mrb[2].mxu1 }
 0x209   :  { %v260_v33 = vpack.c.bf16 %v259_v30, %v259_v30  ;;  %v476_v34 = vpop.f32.mrb[3].mxu1 }
 0x20b   :  { %494 = vmatmul.mubr.bf16.vlgmr.msra.gmra.mrb[4].mxu0 %v260_v33 }
 0x2de   :  { %v366_v36 = vpop.f32.mrb[4].mxu0 }
 0x2df   :  { %v367_v37 = vadd.f32 %v413_v35, %v366_v36  ;;  %v495_v38 = vpop.f32.mrb[5].mxu0 }
 0x2e0   :  { %v369_v39 = vpop.f32.mrb[6].mxu0 }
 0x2e1   :  { %372 = vmax.xlane.f32.xlu0 %v367_v37  ;;  %v496_v40 = vpop.f32.mrb[7].mxu0 }
 0x36e   :  { %v373_v41 = vpop.xlane.xlu0 %372 }
 0x36f   :  { %v374_v42 = vsub.f32 %v367_v37, %v373_v41 }
 0x371   :  { %v375_v43 = vmul.f32 1.442695, %v374_v42 }
 0x373   :  { %526 = vpow2.f32 %v375_v43 }
 0x37d   :  { %v527_v44 = vpop.eup %526 }
 0x37e   :  { %377 = vadd.xlane.f32.xlu0 %v527_v44 }
 0x40b   :  { %v378_v45 = vpop.xlane.xlu0 %377 }
 0x40c   :  { %528 = vrcp.f32 %v378_v45 }
 0x416   :  { %v529_v46 = vpop.eup %528 }
 0x417   :  { %v380_v47 = vmul.f32 %v529_v46, %v527_v44 }
 0x419   :  { %382 = vst.msk [vmem:[#allocation10] sm:$0xff] %vm381_vm2, %v380_v47 }
 0x41a   :  { %629 = shalt.err (!%p626_p8)
}
 0x41b   :  { %s630_s19 = scalar_lea.hbm %s790_s5, 128 }
 0x41c   :  { %p631_p9 = scmp.ne.s32.totalorder %s790_s5, %s630_s19  ;;  %p634_p10 = scmp.lt.u32.totalorder %s630_s19, %s790_s5 }
 0x41e   :  { %p636_p11 = pnand %p634_p10, %p631_p9 }
 0x420   :  { %639 = shalt.err (!%p636_p11)
}
 0x421   :  { %392 = dma.vmem_to_hbm [thread:$0]  %s390_s17, 128, %s790_s5, [#allocation4]  }
 0x422   :  { %646 = dma.done.wait [#allocation4], 128  }
 0x423   :  { %647 = vsyncadd [#allocation4], 4294967168 }
 0x424   :  { %396 = vsyncpa [#allocation3], 1 }
 0x425   :  { %397 = vsyncpa [#allocation6], 1 }
 0x426   :  { %398 = vsyncpa [#allocation9], 1 }
 0x427   :  { %399 = vsyncpa [#allocation4], 1 }

</bundles_post_ra>
